<compile_context>
chip_gen: v5e
topology: v5e:2x2
jax: 0.10.0
libtpu: 0.0.40
codegen_flags: <defaults>
</compile_context>

<pallas_src>
from functools import partial

import jax
import jax.numpy as jnp
from jax.experimental import pallas as pl
from jax.experimental.pallas import tpu as pltpu

NEG_INF = -1e30


def _vmem_limit_bytes():
    """Scoped-VMEM limit per generation: ~78% of physical, capped at 100 MiB.

    v5e/v6e (128 MiB physical) -> 100 MiB; v7x (64 MiB per TC) -> ~50 MiB.
    """
    try:
        cap = int(pltpu.get_tpu_info().vmem_capacity_bytes)
    except Exception:
        cap = 64 * 1024 * 1024  # conservative fallback (v7x per-core VMEM)
    return int(min(cap * 0.78, 100 * 1024 * 1024))


_VMEM_LIMIT = _vmem_limit_bytes()
_VMEM = pl.BlockSpec(memory_space=pltpu.MemorySpace.VMEM)


# --------------------------------------------------------------------------
# Projection kernel: run once per layer (no grid). x, W, h are O(N * F);
# only the N^2 adjacency needs streaming (handled by the attention kernels).
# --------------------------------------------------------------------------
def gat_project_kernel(x_ref, w_ref, asrc_blk_ref, adst_blk_ref,
                       h_ref, asrc_ref, adst_ref):
    # f32 accumulation to match the PyTorch float32 module
    h = jnp.dot(x_ref[...], w_ref[...], preferred_element_type=jnp.float32)   # [N, H*C]
    h_ref[...] = h
    # Per-node per-head attention scores via block-diagonal MXU matmuls
    # (no per-head lane slices / cross-lane row reductions).
    asrc_ref[...] = jnp.dot(h, asrc_blk_ref[...], preferred_element_type=jnp.float32)  # [N, H]
    adst_ref[...] = jnp.dot(h, adst_blk_ref[...], preferred_element_type=jnp.float32)  # [N, H]


# --------------------------------------------------------------------------
# Shared per-row-tile attention math (used by both attention kernels).
# --------------------------------------------------------------------------
def _attention_tile(adj_ref, asrc_t_ref, adst_ref, h_ref, bias_ref, *, heads, head_dim):
    # adj_ref:    [tile, N] int8  (streams; adj[i, j] = 1 iff edge j -> i)
    # asrc_t_ref: [H, N]  f32     (resident)
    # adst_ref:   [tile, H] f32
    # h_ref:      [N, H*C] f32    (resident, plain h -- no block-diagonal copy)
    # bias_ref:   [1, H*C] f32
    mask = adj_ref[...] != 0                           # int8 compare, no widening
    adst = adst_ref[...]                               # [tile, H]

    outs = []
    for hd in range(heads):
        src = asrc_t_ref[hd:hd + 1, :]                 # [1, N]  sublane slice
        e = adst[:, hd:hd + 1] + src                   # e[i,j] = a_dst.h[i] + a_src.h[j]
        e = jnp.maximum(e, 0.2 * e)                    # LeakyReLU(0.2), slope < 1
        e = jnp.where(mask, e, NEG_INF)
        e = e - jnp.max(e, axis=-1, keepdims=True)     # stable softmax over incoming edges
        p = jnp.exp(e)                                 # masked entries underflow to 0
        denom = jnp.sum(p, axis=-1, keepdims=True)     # >= 1 (self-loops)
        # Unnormalized p goes straight to the MXU; normalize the tiny [tile, C]
        # result instead of the [tile, N] probabilities (N/C x fewer VALU ops).
        agg = jnp.dot(p, h_ref[:, hd * head_dim:(hd + 1) * head_dim],
                      preferred_element_type=jnp.float32)               # [tile, C]
        outs.append(agg / denom)                       # exact divide (cheap here)

    out = jnp.concatenate(outs, axis=-1)               # [tile, H*C] (tiny)
    return jnp.maximum(out + bias_ref[...], 0.0)       # bias + ReLU, one wide store


def gat_attention_kernel(adj_ref, asrc_t_ref, adst_ref, h_ref, bias_ref, out_ref,
                         *, heads, head_dim):
    out_ref[...] = _attention_tile(adj_ref, asrc_t_ref, adst_ref, h_ref, bias_ref,
                                   heads=heads, head_dim=head_dim)


def gat_partial_sum_kernel(adj_ref, asrc_t_ref, adst_ref, h_ref, bias_ref, psum_ref,
                           *, heads, head_dim):
    # Heavy part of the last layer: per-tile column sums, fully parallel grid
    # (no serializing accumulator -> both v7x TensorCores stay busy).
    tile_out = _attention_tile(adj_ref, asrc_t_ref, adst_ref, h_ref, bias_ref,
                               heads=heads, head_dim=head_dim)           # [tile, H*C]
    psum_ref[0] = jnp.sum(tile_out, axis=0, keepdims=True)               # [1, H*C]


def pool_fc_kernel(psum_ref, wfc_ref, bfc_ref, out_ref, *, n_nodes):
    # Trailing tiny kernel: global_mean_pool + fc.
    pooled = jnp.sum(psum_ref[...], axis=0) * (1.0 / n_nodes)            # [1, H*C]
    out_ref[...] = jnp.dot(pooled, wfc_ref[...],
                           preferred_element_type=jnp.float32) + bfc_ref[...]


# --------------------------------------------------------------------------
# Host-side wrappers
# --------------------------------------------------------------------------
def _pick_row_tile(n_nodes, hc, heads, max_tile=512):
    """Largest multiple-of-32 row tile (<= max_tile) dividing N that fits the
    per-generation VMEM budget (resident h + streamed int8 adj + live temps)."""
    budget = int(_VMEM_LIMIT * 0.8)                       # headroom for compiler scratch
    resident = (n_nodes * hc + heads * n_nodes + hc) * 4  # h + asrc_t + bias (f32)

    def fits(t):
        stream = 2 * t * n_nodes                          # int8 adj, double-buffered
        io_tiles = 2 * t * (heads + hc) * 4               # adst + out tiles, double-buffered
        temps = 5 * t * n_nodes * 4                       # live f32 temporaries (e/p/...)
        return resident + stream + io_tiles + temps <= budget

    best = None
    for t in range(32, min(max_tile, n_nodes) + 1, 32):
        if n_nodes % t == 0 and fits(t):
            best = t
    if best is not None:
        return best
    if n_nodes <= max_tile and fits(n_nodes):
        return n_nodes
    for t in range(32, n_nodes, 32):
        if n_nodes % t == 0:
            return t
    return n_nodes


def _block_diag_att(att):
    """[H, C] attention vector -> [H*C, H] block-diagonal matrix (host-side)."""
    h, c = att.shape
    m = jnp.zeros((h * c, h), jnp.float32)
    for i in range(h):
        m = m.at[i * c:(i + 1) * c, i].set(att[i])
    return m


def gat_project(x, w, att_src_blk, att_dst_blk, *, heads, head_dim):
    n = x.shape[0]
    hc = heads * head_dim
    return pl.pallas_call(
        gat_project_kernel,
        out_shape=(jax.ShapeDtypeStruct((n, hc), jnp.float32),      # h
                   jax.ShapeDtypeStruct((n, heads), jnp.float32),   # alpha_src
                   jax.ShapeDtypeStruct((n, heads), jnp.float32)),  # alpha_dst
        in_specs=[_VMEM] * 4,
        out_specs=(_VMEM, _VMEM, _VMEM),
        compiler_params=pltpu.CompilerParams(vmem_limit_bytes=_VMEM_LIMIT),
    )(x, w, att_src_blk, att_dst_blk)


def _attention_in_specs(n, tile, heads, hc):
    return [
        pl.BlockSpec((tile, n), lambda i: (i, 0)),        # adj rows stream (int8)
        pl.BlockSpec((heads, n), lambda i: (0, 0)),       # alpha_src^T resident
        pl.BlockSpec((tile, heads), lambda i: (i, 0)),    # alpha_dst row tile
        pl.BlockSpec((n, hc), lambda i: (0, 0)),          # plain h resident
        pl.BlockSpec((1, hc), lambda i: (0, 0)),          # bias resident
    ]


def gat_attention(adj_i8, asrc_t, adst, h, bias, *, heads, head_dim, row_tile=None):
    n = adj_i8.shape[0]
    hc = heads * head_dim
    tile = row_tile or _pick_row_tile(n, hc, heads)
    assert n % tile == 0 and (tile % 32 == 0 or tile == n)
    return pl.pallas_call(
        partial(gat_attention_kernel, heads=heads, head_dim=head_dim),
        out_shape=jax.ShapeDtypeStruct((n, hc), jnp.float32),
        grid=(n // tile,),
        in_specs=_attention_in_specs(n, tile, heads, hc),
        out_specs=pl.BlockSpec((tile, hc), lambda i: (i, 0)),
        compiler_params=pltpu.CompilerParams(
            dimension_semantics=("parallel",),            # shards row tiles on v7x
            vmem_limit_bytes=_VMEM_LIMIT),
    )(adj_i8, asrc_t, adst, h, bias)


def gat_attention_partial_sums(adj_i8, asrc_t, adst, h, bias, *,
                               heads, head_dim, row_tile=None):
    n = adj_i8.shape[0]
    hc = heads * head_dim
    tile = row_tile or _pick_row_tile(n, hc, heads)
    assert n % tile == 0 and (tile % 32 == 0 or tile == n)
    num_tiles = n // tile
    return pl.pallas_call(
        partial(gat_partial_sum_kernel, heads=heads, head_dim=head_dim),
        out_shape=jax.ShapeDtypeStruct((num_tiles, 1, hc), jnp.float32),
        grid=(num_tiles,),
        in_specs=_attention_in_specs(n, tile, heads, hc),
        out_specs=pl.BlockSpec((1, 1, hc), lambda i: (i, 0, 0)),
        compiler_params=pltpu.CompilerParams(
            dimension_semantics=("parallel",),            # no accumulator -> stays parallel
            vmem_limit_bytes=_VMEM_LIMIT),
    )(adj_i8, asrc_t, adst, h, bias)


def pool_fc(psums, fc_w, fc_b, *, n_nodes):
    n_class = fc_w.shape[1]
    return pl.pallas_call(
        partial(pool_fc_kernel, n_nodes=n_nodes),
        out_shape=jax.ShapeDtypeStruct((1, n_class), jnp.float32),
        in_specs=[_VMEM] * 3,
        out_specs=_VMEM,
        compiler_params=pltpu.CompilerParams(vmem_limit_bytes=_VMEM_LIMIT),
    )(psums, fc_w, fc_b)


def gat_forward(feat, adj_i8, params, *, row_tile=None):
    x = feat
    n = feat.shape[0]
    n_layers = len(params["gc_layers"])
    for li, layer in enumerate(params["gc_layers"]):
        heads, head_dim = layer["heads"], layer["head_dim"]
        h, asrc, adst = gat_project(x, layer["w"], layer["att_src_blk"],
                                    layer["att_dst_blk"],
                                    heads=heads, head_dim=head_dim)
        # TODO(synk): tiny [N,H]->[H,N] transpose kept as a host HLO between the two
        # pallas calls; folding it in-kernel needs a transposed dot / XLU transpose.
        asrc_t = jnp.transpose(asrc)
        if li < n_layers - 1:
            x = gat_attention(adj_i8, asrc_t, adst, h, layer["bias"],
                              heads=heads, head_dim=head_dim, row_tile=row_tile)
            # TODO(synk): F.dropout between layers is identity (eval / training=False).
        else:
            psums = gat_attention_partial_sums(adj_i8, asrc_t, adst, h, layer["bias"],
                                               heads=heads, head_dim=head_dim,
                                               row_tile=row_tile)
            return pool_fc(psums, params["fc_w"], params["fc_b"], n_nodes=n)


def init_params(key, n_feat, n_hid, n_class, heads=4, n_layer=2):
    head_dim = n_hid // heads
    layers = []
    for i in range(n_layer):
        f_in = n_feat if i == 0 else n_hid
        key, k1, k2, k3 = jax.random.split(key, 4)
        att_src = jax.random.normal(k2, (heads, head_dim), jnp.float32) * 0.1
        att_dst = jax.random.normal(k3, (heads, head_dim), jnp.float32) * 0.1
        layers.append(dict(
            w=jax.random.normal(k1, (f_in, heads * head_dim), jnp.float32) * 0.1,
            att_src_blk=_block_diag_att(att_src),     # [H*C, H]
            att_dst_blk=_block_diag_att(att_dst),     # [H*C, H]
            bias=jnp.zeros((1, heads * head_dim), jnp.float32),
            heads=heads, head_dim=head_dim,
        ))
    key, kw, kb = jax.random.split(key, 3)
    return dict(
        gc_layers=layers,
        fc_w=jax.random.normal(kw, (n_hid, n_class), jnp.float32) * 0.1,
        fc_b=jax.random.normal(kb, (1, n_class), jnp.float32) * 0.1,
    )


if __name__ == "__main__":
    N, E = 128, 384
    n_feat, n_hid, n_class, heads = 16, 32, 4, 4
    # Demo-only: multiple-of-32 tile giving 2 row tiles to exercise the streamed
    # grid.  Leave row_tile=None in production for VMEM-budget-driven sizing.
    row_tile = 64

    key = jax.random.PRNGKey(0)
    key, kf, ks, kd = jax.random.split(key, 4)

    feat = jax.random.normal(kf, (N, n_feat), jnp.float32)
    src = jax.random.randint(ks, (E,), 0, N)
    dst = jax.random.randint(kd, (E,), 0, N)

    # dense int8 adjacency: adj[i, j] = 1 iff edge j -> i; self-loops added
    # (GATConv add_self_loops=True) -> every row has >= 1 edge (softmax safe).
    adj = jnp.zeros((N, N), jnp.int8)
    adj = adj.at[dst, src].set(jnp.int8(1))
    adj = jnp.maximum(adj, jnp.eye(N, dtype=jnp.int8))

    params = init_params(key, n_feat, n_hid, n_class, heads=heads, n_layer=2)

    out = gat_forward(feat, adj, params, row_tile=row_tile)   # [1, n_class]
    jax.block_until_ready(out)
    assert out.shape == (1, n_class)
    print("KERNEL_OK")
</pallas_src>

<mosaic_0001>
module attributes {stable_mosaic.version = 11 : i64} {
  func.func @gat_project_kernel(%arg0: memref<128x16xf32, #tpu.memory_space<vmem>>, %arg1: memref<16x32xf32, #tpu.memory_space<vmem>>, %arg2: memref<32x4xf32, #tpu.memory_space<vmem>>, %arg3: memref<32x4xf32, #tpu.memory_space<vmem>>, %arg4: memref<128x32xf32, #tpu.memory_space<vmem>>, %arg5: memref<128x4xf32, #tpu.memory_space<vmem>>, %arg6: memref<128x4xf32, #tpu.memory_space<vmem>>) attributes {dimension_semantics = [], scalar_prefetch = 0 : i64, scratch_operands = 0 : i64, tpu.core_type = #tpu.core_type<tc>} {
    %c0 = arith.constant 0 : index
    %c0_0 = arith.constant 0 : index
    %0 = vector.load %arg0[%c0, %c0_0] : memref<128x16xf32, #tpu.memory_space<vmem>>, vector<128x16xf32>
    %c0_1 = arith.constant 0 : index
    %c0_2 = arith.constant 0 : index
    %1 = vector.load %arg1[%c0_1, %c0_2] : memref<16x32xf32, #tpu.memory_space<vmem>>, vector<16x32xf32>
    %cst = arith.constant dense<0.000000e+00> : vector<128x32xf32>
    %2 = tpu.matmul %0, %1, %cst {dimension_numbers = #tpu.dot_dimension_numbers<[1], [0], [0], [1], [0, 0, 1, 1], [], []>} : vector<128x16xf32>, vector<16x32xf32>, vector<128x32xf32> -> vector<128x32xf32>
    %c0_3 = arith.constant 0 : index
    %c0_4 = arith.constant 0 : index
    %3 = vector.load %arg4[%c0_3, %c0_4] : memref<128x32xf32, #tpu.memory_space<vmem>>, vector<128x32xf32>
    tpu.vector_store %arg4[%c0_3, %c0_4], %2 {strides = array<i32>} : memref<128x32xf32, #tpu.memory_space<vmem>>, vector<128x32xf32>,
    %c0_5 = arith.constant 0 : index
    %c0_6 = arith.constant 0 : index
    %4 = vector.load %arg2[%c0_5, %c0_6] : memref<32x4xf32, #tpu.memory_space<vmem>>, vector<32x4xf32>
    %cst_7 = arith.constant dense<0.000000e+00> : vector<128x4xf32>
    %5 = tpu.matmul %2, %4, %cst_7 {dimension_numbers = #tpu.dot_dimension_numbers<[1], [0], [0], [1], [0, 0, 1, 1], [], []>} : vector<128x32xf32>, vector<32x4xf32>, vector<128x4xf32> -> vector<128x4xf32>
    %c0_8 = arith.constant 0 : index
    %c0_9 = arith.constant 0 : index
    %6 = vector.load %arg5[%c0_8, %c0_9] : memref<128x4xf32, #tpu.memory_space<vmem>>, vector<128x4xf32>
    tpu.vector_store %arg5[%c0_8, %c0_9], %5 {strides = array<i32>} : memref<128x4xf32, #tpu.memory_space<vmem>>, vector<128x4xf32>,
    %c0_10 = arith.constant 0 : index
    %c0_11 = arith.constant 0 : index
    %7 = vector.load %arg3[%c0_10, %c0_11] : memref<32x4xf32, #tpu.memory_space<vmem>>, vector<32x4xf32>
    %cst_12 = arith.constant dense<0.000000e+00> : vector<128x4xf32>
    %8 = tpu.matmul %2, %7, %cst_12 {dimension_numbers = #tpu.dot_dimension_numbers<[1], [0], [0], [1], [0, 0, 1, 1], [], []>} : vector<128x32xf32>, vector<32x4xf32>, vector<128x4xf32> -> vector<128x4xf32>
    %c0_13 = arith.constant 0 : index
    %c0_14 = arith.constant 0 : index
    %9 = vector.load %arg6[%c0_13, %c0_14] : memref<128x4xf32, #tpu.memory_space<vmem>>, vector<128x4xf32>
    tpu.vector_store %arg6[%c0_13, %c0_14], %8 {strides = array<i32>} : memref<128x4xf32, #tpu.memory_space<vmem>>, vector<128x4xf32>,
    return
  }
}

</mosaic_0001>

<bundles_post_ra>
// kernel: tpu_custom_call.1
= control target key start
LH: loop header
LB: loop body
LE: loop exit
PB: predicated region body
PF: predicated region fallthrough
CT: control target
= control target key end

     0   :  { %vm38_vm0 = vcmask 130048   ;;  %vm152_vm1 = vcmask 261120   ;;  %vm286_vm2 = vcmask 31744   ;;  %s811_s1 = inlined_call_operand.vmem [shape: f32[16,32], index: 1, kind: input, shape index: {}]   ;;  %s812_s0 = inlined_call_operand.vmem [shape: f32[128,16], index: 0, kind: input, shape index: {}]   ;;  %s813_s2 = inlined_call_operand.vmem [shape: f32[32,4], index: 2, kind: input, shape index: {}]   ;;  %s814_s3 = inlined_call_operand.vmem [shape: f32[32,4], index: 3, kind: input, shape index: {}]   ;;  %s815_s4 = inlined_call_operand.vmem [shape: f32[128,32], index: 4, kind: output, shape index: {0}]   ;;  %s816_s5 = inlined_call_operand.vmem [shape: f32[128,4], index: 5, kind: output, shape index: {1}]   ;;  %s817_s6 = inlined_call_operand.vmem [shape: f32[128,4], index: 6, kind: output, shape index: {2}]  }
   0x1   :  { %v37_v0 = vld [vmem:[%s811_s1 + $0x8] sm:$0xff]  ;;  %v36_v1 = vld [vmem:[%s811_s1] sm:$0xff]  ;;  %v22_v4 = vld [vmem:[%s812_s0 + $0x10] sm:$0xff] }
   0x2   :  { %101 = vmatpush.msra.mxu0 %v37_v0  ;;  %v20_v2 = vld [vmem:[%s812_s0] sm:$0xff]  ;;  %448 = vmatpush.msra.mxu3 %v37_v0  ;;  %v21_v3 = vld [vmem:[%s812_s0 + $0x8] sm:$0xff]  ;;  %v23_v5 = vld [vmem:[%s812_s0 + $0x18] sm:$0xff] }
   0x3   :  { %v24_v6 = vld [vmem:[%s812_s0 + $0x20] sm:$0xff]  ;;  %v25_v7 = vld [vmem:[%s812_s0 + $0x28] sm:$0xff]  ;;  %v26_v8 = vld [vmem:[%s812_s0 + $0x30] sm:$0xff] }
   0x4   :  { %102 = vmatpush.msra.mxu0 %v36_v1  ;;  %449 = vmatpush.msra.mxu3 %v36_v1  ;;  %v27_v9 = vld [vmem:[%s812_s0 + $0x38] sm:$0xff]  ;;  %v28_v10 = vld [vmem:[%s812_s0 + $0x40] sm:$0xff]  ;;  %v33_v11 = vld [vmem:[%s812_s0 + $0x68] sm:$0xff] }
   0x5   :  { %400 = vmatmul.msk.f32.vlgmr.msra.gmra.mxu0 %vm38_vm0, %v20_v2  ;;  %413 = vmatmul.msk.f32.vlgmr.msra.gmra.mxu3 %vm38_vm0, %v33_v11  ;;  %v172_v12 = vld [vmem:[%s813_s2 + $0x18] sm:$0xff]  ;;  %v171_v14 = vld [vmem:[%s813_s2 + $0x10] sm:$0xff]  ;;  %v170_v16 = vld [vmem:[%s813_s2 + $0x8] sm:$0xff] }
   0x6   :  { %v306_v13 = vld [vmem:[%s814_s3 + $0x18] sm:$0xff]  ;;  %233 = vmatpush.msra.mxu1 %v172_v12  ;;  %v305_v15 = vld [vmem:[%s814_s3 + $0x10] sm:$0xff]  ;;  %v304_v17 = vld [vmem:[%s814_s3 + $0x8] sm:$0xff]  ;;  %450 = vmatpush.msrb.mxu3 %v172_v12 }
   0x7   :  { %319 = vmatpush.msra.mxu2 %v306_v13  ;;  %v29_v18 = vld [vmem:[%s812_s0 + $0x48] sm:$0xff]  ;;  %v34_v19 = vld [vmem:[%s812_s0 + $0x70] sm:$0xff]  ;;  %v35_v21 = vld [vmem:[%s812_s0 + $0x78] sm:$0xff] }
   0x8   :  { %234 = vmatpush.msra.mxu1 %v171_v14  ;;  %451 = vmatpush.msrb.mxu3 %v171_v14  ;;  %v30_v20 = vld [vmem:[%s812_s0 + $0x50] sm:$0xff]  ;;  %v31_v22 = vld [vmem:[%s812_s0 + $0x58] sm:$0xff]  ;;  %v169_v23 = vld [vmem:[%s813_s2] sm:$0xff] }
   0x9   :  { %320 = vmatpush.msra.mxu2 %v305_v15  ;;  %v303_v24 = vld [vmem:[%s814_s3] sm:$0xff] }
   0xa   :  { %235 = vmatpush.msra.mxu1 %v170_v16  ;;  %452 = vmatpush.msrb.mxu3 %v170_v16  ;;  %v32_v25 = vld [vmem:[%s812_s0 + $0x60] sm:$0xff] }
   0xb   :  { %321 = vmatpush.msra.mxu2 %v304_v17 }
   0xc   :  { %236 = vmatpush.msra.mxu1 %v169_v23  ;;  %453 = vmatpush.msrb.mxu3 %v169_v23 }
   0xd   :  { %401 = vmatmul.msk.f32.gmra.mxu0 %vm38_vm0, %v21_v3  ;;  %414 = vmatmul.msk.f32.gmra.mxu3 %vm38_vm0, %v34_v19 }
   0xe   :  { %322 = vmatpush.msra.mxu2 %v303_v24  ;;  %454 = vmatpush.msra.mxu3 %v306_v13 }
  0x10   :  { %455 = vmatpush.msra.mxu3 %v305_v15 }
  0x12   :  { %456 = vmatpush.msra.mxu3 %v304_v17 }
  0x14   :  { %457 = vmatpush.msra.mxu3 %v303_v24 }
  0x15   :  { %402 = vmatmul.msk.f32.gmra.mxu0 %vm38_vm0, %v22_v4  ;;  %415 = vmatmul.msk.f32.gmra.mxu3 %vm38_vm0, %v35_v21 }
  0x1d   :  { %403 = vmatmul.msk.f32.gmra.mxu0 %vm38_vm0, %v23_v5 }
  0x25   :  { %404 = vmatmul.msk.f32.gmra.mxu0 %vm38_vm0, %v24_v6 }
  0x2d   :  { %405 = vmatmul.msk.f32.gmra.mxu0 %vm38_vm0, %v25_v7 }
  0x35   :  { %406 = vmatmul.msk.f32.gmra.mxu0 %vm38_vm0, %v26_v8 }
  0x3d   :  { %407 = vmatmul.msk.f32.gmra.mxu0 %vm38_vm0, %v27_v9 }
  0x45   :  { %408 = vmatmul.msk.f32.gmra.mxu0 %vm38_vm0, %v28_v10 }
  0x4d   :  { %409 = vmatmul.msk.f32.gmra.mxu0 %vm38_vm0, %v29_v18 }
  0x55   :  { %410 = vmatmul.msk.f32.gmra.mxu0 %vm38_vm0, %v30_v20 }
  0x5d   :  { %411 = vmatmul.msk.f32.gmra.mxu0 %vm38_vm0, %v31_v22 }
  0x65   :  { %412 = vmatmul.msk.f32.gmra.mxu0 %vm38_vm0, %v32_v25 }
  0x82   :  { %v104_v26 = vpop.f32.mrf.mxu0 }
  0x83   :  { %153 = vst.msk [vmem:[%s815_s4] sm:$0xff] %vm152_vm1, %v104_v26  ;;  %416 = vmatmul.msk.f32.vlgmr.msra.gmra.mxu1 %vm152_vm1, %v104_v26  ;;  %432 = vmatmul.msk.f32.vlgmr.msra.gmra.mxu2 %vm152_vm1, %v104_v26 }
  0x88   :  { %v143_v35 = vpop.f32.mrf.mxu3 }
  0x89   :  { %166 = vst.msk [vmem:[%s815_s4 + $0x68] sm:$0xff] %vm152_vm1, %v143_v35 }
  0x8a   :  { %v107_v27 = vpop.f32.mrf.mxu0 }
  0x8b   :  { %154 = vst.msk [vmem:[%s815_s4 + $0x8] sm:$0xff] %vm152_vm1, %v107_v27  ;;  %417 = vmatmul.msk.f32.gmra.mxu1 %vm152_vm1, %v107_v27  ;;  %433 = vmatmul.msk.f32.gmra.mxu2 %vm152_vm1, %v107_v27 }
  0x90   :  { %v146_v37 = vpop.f32.mrf.mxu3 }
  0x91   :  { %167 = vst.msk [vmem:[%s815_s4 + $0x70] sm:$0xff] %vm152_vm1, %v146_v37 }
  0x92   :  { %v110_v28 = vpop.f32.mrf.mxu0 }
  0x93   :  { %155 = vst.msk [vmem:[%s815_s4 + $0x10] sm:$0xff] %vm152_vm1, %v110_v28  ;;  %418 = vmatmul.msk.f32.gmra.mxu1 %vm152_vm1, %v110_v28  ;;  %434 = vmatmul.msk.f32.gmra.mxu2 %vm152_vm1, %v110_v28 }
  0x98   :  { %v149_v39 = vpop.f32.mrf.mxu3 }
  0x99   :  { %168 = vst.msk [vmem:[%s815_s4 + $0x78] sm:$0xff] %vm152_vm1, %v149_v39 }
  0x9a   :  { %v113_v29 = vpop.f32.mrf.mxu0 }
  0x9b   :  { %156 = vst.msk [vmem:[%s815_s4 + $0x18] sm:$0xff] %vm152_vm1, %v113_v29  ;;  %419 = vmatmul.msk.f32.gmra.mxu1 %vm152_vm1, %v113_v29  ;;  %435 = vmatmul.msk.f32.gmra.mxu2 %vm152_vm1, %v113_v29 }
  0xa2   :  { %v116_v30 = vpop.f32.mrf.mxu0 }
  0xa3   :  { %157 = vst.msk [vmem:[%s815_s4 + $0x20] sm:$0xff] %vm152_vm1, %v116_v30  ;;  %420 = vmatmul.msk.f32.gmra.mxu1 %vm152_vm1, %v116_v30  ;;  %436 = vmatmul.msk.f32.gmra.mxu2 %vm152_vm1, %v116_v30 }
  0xaa   :  { %v119_v31 = vpop.f32.mrf.mxu0 }
  0xab   :  { %158 = vst.msk [vmem:[%s815_s4 + $0x28] sm:$0xff] %vm152_vm1, %v119_v31  ;;  %421 = vmatmul.msk.f32.gmra.mxu1 %vm152_vm1, %v119_v31  ;;  %437 = vmatmul.msk.f32.gmra.mxu2 %vm152_vm1, %v119_v31 }
  0xb2   :  { %v122_v32 = vpop.f32.mrf.mxu0 }
  0xb3   :  { %159 = vst.msk [vmem:[%s815_s4 + $0x30] sm:$0xff] %vm152_vm1, %v122_v32  ;;  %422 = vmatmul.msk.f32.gmra.mxu1 %vm152_vm1, %v122_v32  ;;  %438 = vmatmul.msk.f32.gmra.mxu2 %vm152_vm1, %v122_v32 }
  0xba   :  { %v125_v33 = vpop.f32.mrf.mxu0 }
  0xbb   :  { %160 = vst.msk [vmem:[%s815_s4 + $0x38] sm:$0xff] %vm152_vm1, %v125_v33  ;;  %423 = vmatmul.msk.f32.gmra.mxu1 %vm152_vm1, %v125_v33  ;;  %439 = vmatmul.msk.f32.gmra.mxu2 %vm152_vm1, %v125_v33 }
  0xc2   :  { %v128_v34 = vpop.f32.mrf.mxu0 }
  0xc3   :  { %161 = vst.msk [vmem:[%s815_s4 + $0x40] sm:$0xff] %vm152_vm1, %v128_v34  ;;  %424 = vmatmul.msk.f32.gmra.mxu1 %vm152_vm1, %v128_v34  ;;  %440 = vmatmul.msk.f32.gmra.mxu2 %vm152_vm1, %v128_v34 }
  0xca   :  { %v131_v36 = vpop.f32.mrf.mxu0 }
  0xcb   :  { %162 = vst.msk [vmem:[%s815_s4 + $0x48] sm:$0xff] %vm152_vm1, %v131_v36  ;;  %425 = vmatmul.msk.f32.gmra.mxu1 %vm152_vm1, %v131_v36  ;;  %441 = vmatmul.msk.f32.gmra.mxu2 %vm152_vm1, %v131_v36 }
  0xd2   :  { %v134_v38 = vpop.f32.mrf.mxu0 }
  0xd3   :  { %163 = vst.msk [vmem:[%s815_s4 + $0x50] sm:$0xff] %vm152_vm1, %v134_v38  ;;  %426 = vmatmul.msk.f32.gmra.mxu1 %vm152_vm1, %v134_v38  ;;  %442 = vmatmul.msk.f32.gmra.mxu2 %vm152_vm1, %v134_v38 }
  0xda   :  { %v137_v40 = vpop.f32.mrf.mxu0 }
  0xdb   :  { %164 = vst.msk [vmem:[%s815_s4 + $0x58] sm:$0xff] %vm152_vm1, %v137_v40  ;;  %427 = vmatmul.msk.f32.gmra.mxu1 %vm152_vm1, %v137_v40  ;;  %443 = vmatmul.msk.f32.gmra.mxu2 %vm152_vm1, %v137_v40 }
  0xe2   :  { %v140_v41 = vpop.f32.mrf.mxu0 }
  0xe3   :  { %165 = vst.msk [vmem:[%s815_s4 + $0x60] sm:$0xff] %vm152_vm1, %v140_v41  ;;  %428 = vmatmul.msk.f32.vlgmr.msrb.gmra.mxu3 %vm152_vm1, %v140_v41 }
  0xeb   :  { %429 = vmatmul.msk.f32.gmra.mxu3 %vm152_vm1, %v143_v35 }
  0xf3   :  { %430 = vmatmul.msk.f32.gmra.mxu3 %vm152_vm1, %v146_v37 }
  0xfb   :  { %431 = vmatmul.msk.f32.gmra.mxu3 %vm152_vm1, %v149_v39 }
 0x100   :  { %v238_v42 = vpop.f32.mrf.mxu1 }
 0x101   :  { %287 = vst.msk [vmem:[%s816_s5] sm:$0xff] %vm286_vm2, %v238_v42 }
 0x103   :  { %444 = vmatmul.msk.f32.vlgmr.msra.gmra.mxu3 %vm152_vm1, %v140_v41 }
 0x106   :  { %v324_v43 = vpop.f32.mrf.mxu2 }
 0x107   :  { %372 = vst.msk [vmem:[%s817_s6] sm:$0xff] %vm286_vm2, %v324_v43 }
 0x108   :  { %v241_v44 = vpop.f32.mrf.mxu1 }
 0x109   :  { %288 = vst.msk [vmem:[%s816_s5 + $0x8] sm:$0xff] %vm286_vm2, %v241_v44 }
 0x10b   :  { %445 = vmatmul.msk.f32.gmra.mxu3 %vm152_vm1, %v143_v35 }
 0x10e   :  { %v327_v45 = vpop.f32.mrf.mxu2 }
 0x10f   :  { %373 = vst.msk [vmem:[%s817_s6 + $0x8] sm:$0xff] %vm286_vm2, %v327_v45 }
 0x110   :  { %v244_v46 = vpop.f32.mrf.mxu1 }
 0x111   :  { %289 = vst.msk [vmem:[%s816_s5 + $0x10] sm:$0xff] %vm286_vm2, %v244_v46 }
 0x113   :  { %446 = vmatmul.msk.f32.gmra.mxu3 %vm152_vm1, %v146_v37 }
 0x116   :  { %v330_v47 = vpop.f32.mrf.mxu2 }
 0x117   :  { %374 = vst.msk [vmem:[%s817_s6 + $0x10] sm:$0xff] %vm286_vm2, %v330_v47 }
 0x118   :  { %v247_v48 = vpop.f32.mrf.mxu1 }
 0x119   :  { %290 = vst.msk [vmem:[%s816_s5 + $0x18] sm:$0xff] %vm286_vm2, %v247_v48 }
 0x11b   :  { %447 = vmatmul.msk.f32.gmra.mxu3 %vm152_vm1, %v149_v39 }
 0x11e   :  { %v333_v49 = vpop.f32.mrf.mxu2 }
 0x11f   :  { %375 = vst.msk [vmem:[%s817_s6 + $0x18] sm:$0xff] %vm286_vm2, %v333_v49 }
 0x120   :  { %v250_v50 = vpop.f32.mrf.mxu1 }
 0x121   :  { %291 = vst.msk [vmem:[%s816_s5 + $0x20] sm:$0xff] %vm286_vm2, %v250_v50 }
 0x126   :  { %v336_v51 = vpop.f32.mrf.mxu2 }
 0x127   :  { %376 = vst.msk [vmem:[%s817_s6 + $0x20] sm:$0xff] %vm286_vm2, %v336_v51 }
 0x128   :  { %v253_v52 = vpop.f32.mrf.mxu1 }
 0x129   :  { %292 = vst.msk [vmem:[%s816_s5 + $0x28] sm:$0xff] %vm286_vm2, %v253_v52 }
 0x12e   :  { %v339_v53 = vpop.f32.mrf.mxu2 }
 0x12f   :  { %377 = vst.msk [vmem:[%s817_s6 + $0x28] sm:$0xff] %vm286_vm2, %v339_v53 }
 0x130   :  { %v256_v54 = vpop.f32.mrf.mxu1 }
 0x131   :  { %293 = vst.msk [vmem:[%s816_s5 + $0x30] sm:$0xff] %vm286_vm2, %v256_v54 }
 0x136   :  { %v342_v55 = vpop.f32.mrf.mxu2 }
 0x137   :  { %378 = vst.msk [vmem:[%s817_s6 + $0x30] sm:$0xff] %vm286_vm2, %v342_v55 }
 0x138   :  { %v259_v56 = vpop.f32.mrf.mxu1 }
 0x139   :  { %294 = vst.msk [vmem:[%s816_s5 + $0x38] sm:$0xff] %vm286_vm2, %v259_v56 }
 0x13e   :  { %v345_v57 = vpop.f32.mrf.mxu2 }
 0x13f   :  { %379 = vst.msk [vmem:[%s817_s6 + $0x38] sm:$0xff] %vm286_vm2, %v345_v57 }
 0x140   :  { %v262_v58 = vpop.f32.mrf.mxu1 }
 0x141   :  { %295 = vst.msk [vmem:[%s816_s5 + $0x40] sm:$0xff] %vm286_vm2, %v262_v58 }
 0x146   :  { %v348_v59 = vpop.f32.mrf.mxu2 }
 0x147   :  { %380 = vst.msk [vmem:[%s817_s6 + $0x40] sm:$0xff] %vm286_vm2, %v348_v59 }
 0x148   :  { %v265_v60 = vpop.f32.mrf.mxu1 }
 0x149   :  { %296 = vst.msk [vmem:[%s816_s5 + $0x48] sm:$0xff] %vm286_vm2, %v265_v60 }
 0x14e   :  { %v351_v61 = vpop.f32.mrf.mxu2 }
 0x14f   :  { %381 = vst.msk [vmem:[%s817_s6 + $0x48] sm:$0xff] %vm286_vm2, %v351_v61 }
 0x150   :  { %v268_v62 = vpop.f32.mrf.mxu1 }
 0x151   :  { %297 = vst.msk [vmem:[%s816_s5 + $0x50] sm:$0xff] %vm286_vm2, %v268_v62 }
 0x156   :  { %v354_v63 = vpop.f32.mrf.mxu2 }
 0x157   :  { %382 = vst.msk [vmem:[%s817_s6 + $0x50] sm:$0xff] %vm286_vm2, %v354_v63 }
 0x158   :  { %v271_v0 = vpop.f32.mrf.mxu1 }
 0x159   :  { %298 = vst.msk [vmem:[%s816_s5 + $0x58] sm:$0xff] %vm286_vm2, %v271_v0 }
 0x15e   :  { %v357_v1 = vpop.f32.mrf.mxu2 }
 0x15f   :  { %383 = vst.msk [vmem:[%s817_s6 + $0x58] sm:$0xff] %vm286_vm2, %v357_v1 }
 0x166   :  { %v274_v2 = vpop.f32.mrf.mxu3 }
 0x167   :  { %299 = vst.msk [vmem:[%s816_s5 + $0x60] sm:$0xff] %vm286_vm2, %v274_v2 }
 0x16e   :  { %v277_v3 = vpop.f32.mrf.mxu3 }
 0x16f   :  { %300 = vst.msk [vmem:[%s816_s5 + $0x68] sm:$0xff] %vm286_vm2, %v277_v3 }
 0x176   :  { %v280_v4 = vpop.f32.mrf.mxu3 }
 0x177   :  { %301 = vst.msk [vmem:[%s816_s5 + $0x70] sm:$0xff] %vm286_vm2, %v280_v4 }
 0x17e   :  { %v283_v5 = vpop.f32.mrf.mxu3 }
 0x17f   :  { %302 = vst.msk [vmem:[%s816_s5 + $0x78] sm:$0xff] %vm286_vm2, %v283_v5 }
 0x186   :  { %v360_v6 = vpop.f32.mrf.mxu3 }
 0x187   :  { %384 = vst.msk [vmem:[%s817_s6 + $0x60] sm:$0xff] %vm286_vm2, %v360_v6 }
 0x18e   :  { %v363_v7 = vpop.f32.mrf.mxu3 }
 0x18f   :  { %385 = vst.msk [vmem:[%s817_s6 + $0x68] sm:$0xff] %vm286_vm2, %v363_v7 }
 0x196   :  { %v366_v8 = vpop.f32.mrf.mxu3 }
 0x197   :  { %386 = vst.msk [vmem:[%s817_s6 + $0x70] sm:$0xff] %vm286_vm2, %v366_v8 }
 0x19e   :  { %v369_v9 = vpop.f32.mrf.mxu3 }
 0x19f   :  { %387 = vst.msk [vmem:[%s817_s6 + $0x78] sm:$0xff] %vm286_vm2, %v369_v9 }

</bundles_post_ra>
